<compile_context>
chip_gen: v6e
topology: v6e:2x2x1
jax: 0.10.0
libtpu: 0.0.40
codegen_flags: <defaults>
</compile_context>

<pallas_src>
import jax
import jax.numpy as jnp
from jax.experimental import pallas as pl
from jax.experimental.pallas import tpu as pltpu


def _make_cca_kernel(hw_true, hw_pad, hid):
    """Build the kernel body with static spatial extent / hidden width baked in."""
    inv_hw = 1.0 / float(hw_true)
    needs_mask = hw_pad != hw_true

    def kernel(x_ref, w1_ref, b1_ref, w2_ref, b2_ref, o_ref):
        # x block: (Nb, C, HWp) with the (padded) spatial extent on the lanes.
        x = x_ref[...]

        # ---- per-channel spatial stats (two-pass; block is VMEM-resident) ----
        s1 = jnp.sum(x.astype(jnp.float32), axis=-1)            # (Nb, C)
        mean = s1 * inv_hw                                       # zero-padded lanes add 0
        d = x.astype(jnp.float32) - mean[:, :, None]
        if needs_mask:
            lane = jax.lax.broadcasted_iota(jnp.int32, (1, 1, hw_pad), 2)
            d = jnp.where(lane < hw_true, d, 0.0)
        var = jnp.sum(d * d, axis=-1) * inv_hw                   # (Nb, C)
        y = jnp.sqrt(var) + mean                                  # stdv_channels + avg_pool

        # ---- squeeze-excite on the VPU (hid, C tiny; MXU would be pure latency) ----
        w1 = w1_ref[...].astype(jnp.float32)                      # (hid, C)
        h = jnp.sum(y[:, None, :] * w1[None, :, :], axis=-1)      # (Nb, hid)
        h = jnp.maximum(h + b1_ref[...].astype(jnp.float32), 0.0)
        w2 = w2_ref[...].astype(jnp.float32)                      # (C, hid)
        z = b2_ref[...].astype(jnp.float32)                       # (1, C) -> broadcasts over Nb
        for j in range(hid):                                      # hid is static & tiny: unrolled FMA chain
            z = z + h[:, j:j + 1] * w2[:, j][None, :]              # (Nb, 1) * (1, C) -> (Nb, C)
        z = jax.nn.sigmoid(z)                                      # (Nb, C)

        # ---- channel re-scale in the input dtype (lane-dense unmasked stores) ----
        o_ref[...] = (x * z.astype(x.dtype)[:, :, None]).astype(o_ref.dtype)

    return kernel


def _vmem_capacity_bytes():
    """Per-core VMEM capacity; conservative fallback (v7x per-TC) if unknown."""
    try:
        info = pltpu.get_tpu_info()
        for attr in ("vmem_capacity_bytes", "vmem_bytes"):
            cap = getattr(info, attr, None)
            if cap:
                return int(cap)
    except Exception:
        pass
    return 64 << 20


def _choose_nb(n, c, hw_pad, itemsize, vmem_budget_bytes):
    """Images per grid step.

    Footprint per image = double-buffered in + out blocks plus one f32 working
    copy for the stats pass. Targets >= ~8 grid steps (>= ~4 per v7x TC) when
    the batch allows, so the auto-pipeline has DMA/compute overlap.
    """
    per_n = 4 * c * hw_pad * itemsize + c * hw_pad * 4
    max_nb = max(1, int(vmem_budget_bytes // per_n))
    min_steps = min(n, 8)
    return max(1, min(max_nb, n // min_steps))


def cca_layer1(x, w1, b1, w2, b2):
    """x: (N, C, H, W); w1: (C//r, C); b1: (C//r, 1); w2: (C, C//r); b2: (C, 1)."""
    N, C, H, W = x.shape
    hid = w1.shape[0]
    hw = H * W
    hw_pad = ((hw + 127) // 128) * 128          # lane-dense last dim -> unmasked vst
    itemsize = jnp.dtype(x.dtype).itemsize

    cap = _vmem_capacity_bytes()
    vmem_budget = int(cap * 0.35)               # block buffers
    vmem_limit = int(cap * 0.75)                # scoped limit passed to Mosaic

    nb = _choose_nb(N, C, hw_pad, itemsize, vmem_budget)
    n_pad = pl.cdiv(N, nb) * nb
    grid = n_pad // nb

    xr = x.reshape(N, C, hw)
    if hw_pad != hw or n_pad != N:
        xr = jnp.pad(xr, ((0, n_pad - N), (0, 0), (0, hw_pad - hw)))

    b1r = b1.reshape(1, hid)
    b2r = b2.reshape(1, C)

    kernel = _make_cca_kernel(hw, hw_pad, hid)

    out = pl.pallas_call(
        kernel,
        out_shape=jax.ShapeDtypeStruct((n_pad, C, hw_pad), x.dtype),
        grid_spec=pltpu.PrefetchScalarGridSpec(
            num_scalar_prefetch=0,
            grid=(grid,),
            in_specs=[
                pl.BlockSpec((nb, C, hw_pad), lambda n: (n, 0, 0)),
                # Constant index_maps: weights/biases stay resident across steps.
                pl.BlockSpec((hid, C), lambda n: (0, 0)),
                pl.BlockSpec((1, hid), lambda n: (0, 0)),
                pl.BlockSpec((C, hid), lambda n: (0, 0)),
                pl.BlockSpec((1, C), lambda n: (0, 0)),
            ],
            out_specs=pl.BlockSpec((nb, C, hw_pad), lambda n: (n, 0, 0)),
        ),
        compiler_params=pltpu.CompilerParams(
            dimension_semantics=("parallel",),
            vmem_limit_bytes=vmem_limit,
        ),
    )(xr, w1, b1r, w2, b2r)

    out = out[:N, :, :hw]
    return out.reshape(N, C, H, W)


def _reference(x, w1, b1, w2, b2):
    # Pure-JAX reference of the PyTorch forward (for verification).
    xf = x.astype(jnp.float32)
    mean = jnp.mean(xf, axis=(2, 3), keepdims=True)
    var = jnp.mean((xf - mean) ** 2, axis=(2, 3), keepdims=True)
    y = jnp.sqrt(var) + mean                          # (N, C, 1, 1)
    yv = y[..., 0, 0]                                 # (N, C)
    h = jnp.maximum(yv @ w1.T + b1[:, 0], 0.0)        # (N, C//r)
    z = jax.nn.sigmoid(h @ w2.T + b2[:, 0])           # (N, C)
    return (xf * z[:, :, None, None]).astype(x.dtype)


if __name__ == "__main__":
    # Module config: channel=32, reduction=16  ->  hidden = 2
    N, C, H, W = 2, 32, 16, 16
    reduction = 16
    hid = C // reduction

    key = jax.random.PRNGKey(0)
    kx, k1, k2, k3, k4 = jax.random.split(key, 5)

    x = jax.random.normal(kx, (N, C, H, W), dtype=jnp.float32)
    # Conv2d weights are (out_ch, in_ch, 1, 1); stored here as 2-D matmul weights.
    w1 = jax.random.normal(k1, (hid, C), dtype=jnp.float32) * 0.1
    b1 = jax.random.normal(k2, (hid, 1), dtype=jnp.float32) * 0.1
    w2 = jax.random.normal(k3, (C, hid), dtype=jnp.float32) * 0.1
    b2 = jax.random.normal(k4, (C, 1), dtype=jnp.float32) * 0.1

    out = cca_layer1(x, w1, b1, w2, b2)
    out = jax.block_until_ready(out)

    ref = _reference(x, w1, b1, w2, b2)
    assert out.shape == (N, C, H, W)
    assert jnp.allclose(out, ref, atol=1e-4, rtol=1e-5), "mismatch vs reference"

    print("KERNEL_OK")
</pallas_src>

<mosaic_0001>
module attributes {stable_mosaic.version = 11 : i64} {
  func.func @kernel(%arg0: i32, %arg1: memref<1x32x256xf32, #tpu.memory_space<vmem>>, %arg2: memref<2x32xf32, #tpu.memory_space<vmem>>, %arg3: memref<1x2xf32, #tpu.memory_space<vmem>>, %arg4: memref<32x2xf32, #tpu.memory_space<vmem>>, %arg5: memref<1x32xf32, #tpu.memory_space<vmem>>, %arg6: memref<1x32x256xf32, #tpu.memory_space<vmem>>) attributes {dimension_semantics = [#tpu.dimension_semantics<parallel>], iteration_bounds = array<i64: 2>, scalar_prefetch = 0 : i64, scratch_operands = 0 : i64, tpu.core_type = #tpu.core_type<tc>, window_params = [{transform_indices = @transform_0, window_bounds = array<i64: 1, 32, 256>}, {pipeline_mode = #tpu.pipeline_mode<synchronous>, transform_indices = @transform_1, window_bounds = array<i64: 2, 32>}, {pipeline_mode = #tpu.pipeline_mode<synchronous>, transform_indices = @transform_2, window_bounds = array<i64: 1, 2>}, {pipeline_mode = #tpu.pipeline_mode<synchronous>, transform_indices = @transform_3, window_bounds = array<i64: 32, 2>}, {pipeline_mode = #tpu.pipeline_mode<synchronous>, transform_indices = @transform_4, window_bounds = array<i64: 1, 32>}, {transform_indices = @transform_5, window_bounds = array<i64: 1, 32, 256>}]} {
    %c0 = arith.constant 0 : index
    %c0_0 = arith.constant 0 : index
    %c0_1 = arith.constant 0 : index
    %0 = vector.load %arg1[%c0, %c0_0, %c0_1] : memref<1x32x256xf32, #tpu.memory_space<vmem>>, vector<1x32x256xf32>
    %cst = arith.constant dense<0.000000e+00> : vector<1x32xf32>
    %1 = vector.multi_reduction <add>, %0, %cst [2] : vector<1x32x256xf32> to vector<1x32xf32>
    %cst_2 = arith.constant 3.906250e-03 : f32
    %2 = vector.broadcast %cst_2 : f32 to vector<1x32xf32>
    %3 = arith.mulf %1, %2 : vector<1x32xf32>
    %4 = vector.shape_cast %3 : vector<1x32xf32> to vector<1x32x1xf32>
    %5 = vector.broadcast %4 : vector<1x32x1xf32> to vector<1x32x256xf32>
    %6 = arith.subf %0, %5 : vector<1x32x256xf32>
    %7 = arith.mulf %6, %6 : vector<1x32x256xf32>
    %cst_3 = arith.constant dense<0.000000e+00> : vector<1x32xf32>
    %8 = vector.multi_reduction <add>, %7, %cst_3 [2] : vector<1x32x256xf32> to vector<1x32xf32>
    %cst_4 = arith.constant 3.906250e-03 : f32
    %9 = vector.broadcast %cst_4 : f32 to vector<1x32xf32>
    %10 = arith.mulf %8, %9 : vector<1x32xf32>
    %11 = math.sqrt %10 : vector<1x32xf32>
    %12 = arith.addf %11, %3 : vector<1x32xf32>
    %c0_5 = arith.constant 0 : index
    %c0_6 = arith.constant 0 : index
    %13 = vector.load %arg2[%c0_5, %c0_6] : memref<2x32xf32, #tpu.memory_space<vmem>>, vector<2x32xf32>
    %14 = vector.shape_cast %12 : vector<1x32xf32> to vector<1x1x32xf32>
    %15 = vector.shape_cast %13 : vector<2x32xf32> to vector<1x2x32xf32>
    %16 = vector.broadcast %14 : vector<1x1x32xf32> to vector<1x2x32xf32>
    %17 = arith.mulf %16, %15 : vector<1x2x32xf32>
    %cst_7 = arith.constant dense<0.000000e+00> : vector<1x2xf32>
    %18 = vector.multi_reduction <add>, %17, %cst_7 [2] : vector<1x2x32xf32> to vector<1x2xf32>
    %c0_8 = arith.constant 0 : index
    %c0_9 = arith.constant 0 : index
    %19 = vector.load %arg3[%c0_8, %c0_9] : memref<1x2xf32, #tpu.memory_space<vmem>>, vector<1x2xf32>
    %20 = arith.addf %18, %19 : vector<1x2xf32>
    %cst_10 = arith.constant 0.000000e+00 : f32
    %21 = vector.broadcast %cst_10 : f32 to vector<1x2xf32>
    %22 = arith.maximumf %20, %21 : vector<1x2xf32>
    %c0_11 = arith.constant 0 : index
    %c0_12 = arith.constant 0 : index
    %23 = vector.load %arg4[%c0_11, %c0_12] : memref<32x2xf32, #tpu.memory_space<vmem>>, vector<32x2xf32>
    %c0_13 = arith.constant 0 : index
    %c0_14 = arith.constant 0 : index
    %24 = vector.load %arg5[%c0_13, %c0_14] : memref<1x32xf32, #tpu.memory_space<vmem>>, vector<1x32xf32>
    %25 = vector.extract_strided_slice %22 {offsets = [0, 0], sizes = [1, 1], strides = [1, 1]} : vector<1x2xf32> to vector<1x1xf32>
    %26 = vector.extract_strided_slice %23 {offsets = [0, 0], sizes = [32, 1], strides = [1, 1]} : vector<32x2xf32> to vector<32x1xf32>
    %27 = vector.shape_cast %26 : vector<32x1xf32> to vector<32xf32>
    %28 = vector.shape_cast %27 : vector<32xf32> to vector<1x32xf32>
    %29 = vector.broadcast %25 : vector<1x1xf32> to vector<1x32xf32>
    %30 = arith.mulf %29, %28 : vector<1x32xf32>
    %31 = arith.addf %24, %30 : vector<1x32xf32>
    %32 = vector.extract_strided_slice %22 {offsets = [0, 1], sizes = [1, 1], strides = [1, 1]} : vector<1x2xf32> to vector<1x1xf32>
    %33 = vector.extract_strided_slice %23 {offsets = [0, 1], sizes = [32, 1], strides = [1, 1]} : vector<32x2xf32> to vector<32x1xf32>
    %34 = vector.shape_cast %33 : vector<32x1xf32> to vector<32xf32>
    %35 = vector.shape_cast %34 : vector<32xf32> to vector<1x32xf32>
    %36 = vector.broadcast %32 : vector<1x1xf32> to vector<1x32xf32>
    %37 = arith.mulf %36, %35 : vector<1x32xf32>
    %38 = arith.addf %31, %37 : vector<1x32xf32>
    %39 = arith.negf %38 : vector<1x32xf32>
    %40 = math.exp %39 : vector<1x32xf32>
    %cst_15 = arith.constant 1.000000e+00 : f32
    %41 = vector.broadcast %cst_15 : f32 to vector<1x32xf32>
    %42 = arith.addf %41, %40 : vector<1x32xf32>
    %43 = arith.divf %41, %42 : vector<1x32xf32>
    %44 = vector.shape_cast %43 : vector<1x32xf32> to vector<1x32x1xf32>
    %45 = vector.broadcast %44 : vector<1x32x1xf32> to vector<1x32x256xf32>
    %46 = arith.mulf %0, %45 : vector<1x32x256xf32>
    %c0_16 = arith.constant 0 : index
    %c0_17 = arith.constant 0 : index
    %c0_18 = arith.constant 0 : index
    %47 = vector.load %arg6[%c0_16, %c0_17, %c0_18] : memref<1x32x256xf32, #tpu.memory_space<vmem>>, vector<1x32x256xf32>
    tpu.vector_store %arg6[%c0_16, %c0_17, %c0_18], %46 {strides = array<i32>} : memref<1x32x256xf32, #tpu.memory_space<vmem>>, vector<1x32x256xf32>,
    return
  }
  func.func @transform_0(%arg0: i32) -> (i32, i32, i32) {
    %c0_i32 = arith.constant 0 : i32
    %c0_i32_0 = arith.constant 0 : i32
    %c0_i32_1 = arith.constant 0 : i32
    return %arg0, %c0_i32, %c0_i32_0 : i32, i32, i32
  }
  func.func @transform_1(%arg0: i32) -> (i32, i32) {
    %c0_i32 = arith.constant 0 : i32
    %c0_i32_0 = arith.constant 0 : i32
    %c0_i32_1 = arith.constant 0 : i32
    return %c0_i32, %c0_i32_0 : i32, i32
  }
  func.func @transform_2(%arg0: i32) -> (i32, i32) {
    %c0_i32 = arith.constant 0 : i32
    %c0_i32_0 = arith.constant 0 : i32
    %c0_i32_1 = arith.constant 0 : i32
    return %c0_i32, %c0_i32_0 : i32, i32
  }
  func.func @transform_3(%arg0: i32) -> (i32, i32) {
    %c0_i32 = arith.constant 0 : i32
    %c0_i32_0 = arith.constant 0 : i32
    %c0_i32_1 = arith.constant 0 : i32
    return %c0_i32, %c0_i32_0 : i32, i32
  }
  func.func @transform_4(%arg0: i32) -> (i32, i32) {
    %c0_i32 = arith.constant 0 : i32
    %c0_i32_0 = arith.constant 0 : i32
    %c0_i32_1 = arith.constant 0 : i32
    return %c0_i32, %c0_i32_0 : i32, i32
  }
  func.func @transform_5(%arg0: i32) -> (i32, i32, i32) {
    %c0_i32 = arith.constant 0 : i32
    %c0_i32_0 = arith.constant 0 : i32
    %c0_i32_1 = arith.constant 0 : i32
    return %arg0, %c0_i32, %c0_i32_0 : i32, i32, i32
  }
}

</mosaic_0001>

<bundles_post_ra>
// kernel: tpu_custom_call.1
= control target key start
LH: loop header
LB: loop body
LE: loop exit
PB: predicated region body
PF: predicated region fallthrough
CT: control target
= control target key end

     0   :  { %10 = vsyncpa [#allocation3], 0  ;;  %s1196_s0 = inlined_call_operand.hbm [shape: f32[2,32,256], index: 0, kind: input, shape index: {}]   ;;  %s1197_s1 = inlined_call_operand.vmem [shape: f32[2,32], index: 1, kind: input, shape index: {}]   ;;  %s1198_s2 = inlined_call_operand.vmem [shape: f32[1,2], index: 2, kind: input, shape index: {}]   ;;  %s1199_s3 = inlined_call_operand.vmem [shape: f32[32,2], index: 3, kind: input, shape index: {}]   ;;  %s1200_s4 = inlined_call_operand.vmem [shape: f32[1,32], index: 4, kind: input, shape index: {}]   ;;  %s1201_s5 = inlined_call_operand.hbm [shape: f32[2,32,256], index: 5, kind: output, shape index: {}]  }
   0x1   :  { %12 = vsyncpa [#allocation3 + $0x1], 0 }
   0x2   :  { %13 = vsyncpa [#allocation4], 0 }
   0x3   :  { %15 = vsyncpa [#allocation4 + $0x1], 0  ;;  %s932_s18 = smov 0   ;;  %s934_s19 = smov 0  }
   0x4   :  { %s936_s20 = smov 0   ;;  %s938_s21 = smov 0  }
   0x5 LB: > { %s953_s22 = sadd.s32 4294967295, %s891_s21   ;;  %s711_s23 = sadd.s32 4294967294, %s891_s21   ;;  %s891_s21 = sphi %s938_s21, %s1216_s21   ;;  %s887_s20 = sphi %s936_s20, %s1215_s20   ;;  %s883_s19 = sphi %s934_s19, %s1214_s19   ;;  %s879_s18 = sphi %s932_s18, %s1213_s18  }
   0x6   : > { %s957_s24 = sadd.s32 1, %s891_s21   ;;  %s28_s25 = sadd.s32 1, %s887_s20 }
   0x7   : > { %s25_s26 = ssub.s32 %s891_s21, %s957_s24  ;;  %p35_p0 = scmp.ne.s32.totalorder %s887_s20, %s883_s19 }
   0x8   : > { %p26_p1 = scmp.eq.s32.totalorder %s25_s26, 0  ;;  %p36_p2 = scmp.eq.s32.totalorder %s891_s21, 0 }
   0x9   : > { %p41_p3 = scmp.ne.s32.totalorder %s883_s19, %s879_s18  ;;  %p42_p4 = scmp.eq.s32.totalorder %s953_s22, 0 }
   0xa   : > { %s969_s27 = scalar_select %p26_p1, %s887_s20, %s28_s25  }
   0xb   : > { %p971_p5 = por %p36_p2, %p35_p0  ;;  %p975_p6 = por %p42_p4, %p41_p3 }
   0xc   : > { %p149_p7 = scmp.eq.s32.totalorder %s953_s22, 1  ;;  %p155_p8 = scmp.eq.s32.totalorder %s711_s23, 1 }
   0xd   : > { %s1205_s29 = scalar_select %p975_p6, 1, 0 }
   0xe   : > { %p741_p10 = scmp.lt.s32.totalorder %s891_s21, 2  ;;  %p982_p11 = por %p149_p7, %p35_p0 }
   0xf   : > { %p986_p12 = por %p155_p8, %p41_p3  ;;  %s187_s7 = sand.u32 1, %s887_s20  }
  0x10   : > { %s1206_s30 = scalar_select %p982_p11, 1, 0 }
  0x11   : > { %s1207_s6 = scalar_select %p986_p12, 1, 0 }
  0x12   : > { %s727_s8 = sshll.u32 %s891_s21, 10  ;;  %s714_s9 = sshll.u32 %s187_s7, 6 }
  0x13   : > { %s995_s12 = scalar_lea.hbm %s1196_s0, %s727_s8  ;;  %s191_s13 = scalar_lea.vmem [#allocation2], %s714_s9 }
  0x14   : > { %s198_s14 = sshll.u32 %s191_s13, 4  ;;  %p999_p13 = pnand %p741_p10, %p971_p5  ;;  %s1003_s14 = int_to_ptr.vmem [resolvable:$true] %s198_s14 }
  0x15   : > { %s1005_s16 = scalar_lea.sflag [#allocation3], %s187_s7  ;;  %s799_s17 = scalar_lea.hbm %s995_s12, 1024 }
  0x16   : > { %p800_p0 = scmp.ne.s32.totalorder %s995_s12, %s799_s17  ;;  %p801_p1 = pneg %p999_p13 }
  0x17   : > { %s804_s26 = scalar_lea.hbm %s1196_s0, 2048  ;;  %p805_p4 = scmp.lt.s32.totalorder %s995_s12, %s1196_s0 }
  0x18   : > { %p802_p2 = pnand %p801_p1, %p800_p0  ;;  %p806_p5 = scmp.lt.s32.totalorder %s804_s26, %s799_s17 }
  0x1a   : > { %p803_p3 = pneg %p802_p2  ;;  %p807_p7 = por %p806_p5, %p805_p4 }
  0x1c   : > { %p808_p8 = pnand %p807_p7, %p803_p3 }
  0x1e   : > { %811 = shalt.err (!%p808_p8)
}
  0x1f   : > { %s812_s7 = scalar_lea.vmem %s1003_s14, 1024  ;;  %s893_s9 = smov [#allocation2]  }
  0x20   : > { %p813_p10 = scmp.ne.s32.totalorder %s1003_s14, %s812_s7  ;;  %s817_s10 = sshll.u32 %s893_s9, 4  ;;  %s818_s10 = int_to_ptr.vmem [resolvable:$false] %s817_s10 }
  0x21   : > { %s819_s11 = scalar_lea.vmem %s818_s10, 2048  ;;  %p820_p2 = scmp.lt.s32.totalorder %s1003_s14, %s818_s10 }
  0x22   : > { %p815_p9 = pnand %p813_p10, %p801_p1  ;;  %p821_p12 = scmp.lt.s32.totalorder %s819_s11, %s812_s7 }
  0x24   : > { %p816_p0 = pneg %p815_p9  ;;  %p822_p11 = por %p821_p12, %p820_p2 }
  0x26   : > { %p823_p6 = pnand %p822_p11, %p816_p0 }
  0x28   : > { %826 = shalt.err (!%p823_p6)
}
  0x29   : > { %s894_s13 = smov 256   ;;  %s895_s17 = smov 16  }
  0x2a   : > { %736 = dma.hbm_to_vmem [thread:$0]  (!%p999_p13), %s995_s12, 1024, %s1003_s14, %s1005_s16, %s894_s13, %s894_s13, %s895_s17  }
  0x2b   : > { %p717_p9 = scmp.ge.s32.totalorder %s891_s21, 1  ;;  %p206_p1 = scmp.lt.s32.totalorder %s891_s21, 3 }
  0x2d   : > { %p207_p3 = pnand %p717_p9, %p206_p1 }
  0x2e   : > { %s1029_s23 = sand.u32 (!%p207_p3), 1, %s883_s19   ;;  %p1209_p6 = scmp.ne.s32.totalorder (!%p207_p3), %s1205_s29, 0 }
  0x2f   : > { %210 = sbr.rel (%p207_p3) target bundleno = 999 (0x3e7), region = 40  ;;  %s718_s25 = sshll.u32 (!%p207_p3), %s1029_s23, 6 }
  0x30   : > { %s213_s26 = scalar_lea.sflag (!%p207_p3), [#allocation3], %s1029_s23  ;;  %s216_s28 = scalar_lea.vmem (!%p207_p3), [#allocation2], %s718_s25 }
  0x34   : > { %870 = dma.done.wait (%p1209_p6), %s213_s26, 1024  }
  0x35   : > { %872 = vsyncadd (%p1209_p6), %s213_s26, 4294966272  ;;  %v1039_v0 = vld [vmem:[%s216_s28] sm:$0xff]  ;;  %v1041_v1 = vld [vmem:[%s216_s28 + $0x8] sm:$0xff]  ;;  %v333_v12 = vlaneseq  ;;  %v896_v40 = vmov 0   ;;  %vm430_vm8 = vcmask 130112   ;;  %vm437_vm9 = vcmask 195712  }
  0x36   : > { %v1043_v2 = vld [vmem:[%s216_s28 + $0x20] sm:$0xff]  ;;  %v251_v3 = vadd.f32 %v1041_v1, %v1039_v0  ;;  %v1047_v4 = vld [vmem:[%s216_s28 + $0x28] sm:$0xff]  ;;  %v1049_v5 = vld [vmem:[%s216_s28 + $0x10] sm:$0xff]  ;;  %782 = vset.pattern.permute.xlu0 %v896_v40  ;;  %783 = vset.pattern.permute.xlu1 %v896_v40  ;;  %vm444_vm10 = vcmask 261312   ;;  %vm465_vm11 = vcmask 1041409   ;;  %vm468_vm12 = vcmask 254976  }
  0x37   : > { %v1051_v6 = vld [vmem:[%s216_s28 + $0x18] sm:$0xff]  ;;  %v257_v7 = vadd.f32 %v1047_v4, %v1043_v2  ;;  %v1055_v8 = vld [vmem:[%s216_s28 + $0x30] sm:$0xff]  ;;  %v1064_v13 = vshrl.u32 %v333_v12, 7  ;;  %v331_v15 = vld [vmem:[%s1197_s1] sm:$0x3]  ;;  %s242_s29 = scalar_lea.vmem [#allocation5], %s718_s25 }
  0x38   : > { %v1057_v9 = vld [vmem:[%s216_s28 + $0x38] sm:$0xff]  ;;  %252 = vadd.xlane.f32.xlu0 %v251_v3  ;;  %v254_v10 = vadd.f32 %v1051_v6, %v1049_v5  ;;  %s638_s12 = sshll.u32 %s242_s29, 4  ;;  %s728_s14 = sshll.u32 %s953_s22, 10  ;;  %s1146_s12 = int_to_ptr.vmem [resolvable:$true] %s638_s12 }
  0x39   : > { %258 = vadd.xlane.f32.xlu1 %v257_v7  ;;  %v260_v11 = vadd.f32 %v1057_v9, %v1055_v8  ;;  %v335_v14 = vsub.s32 0, %v1064_v13  ;;  %v354_v17 = vsub.s32 1, %v1064_v13  ;;  %s1151_s16 = scalar_lea.hbm %s1201_s5, %s728_s14  ;;  %s625_s22 = scalar_lea.sflag [#allocation4], %s1029_s23 }
  0x3a   : > { %s827_s8 = scalar_lea.vmem %s1146_s12, 1024  ;;  %p1210_p12 = scmp.ne.s32.totalorder %s1206_s30, 0 }
  0x3b   : > { %v336_v16 = vrot.slane %v331_v15, %v335_v14  ;;  %v355_v18 = vrot.slane %v331_v15, %v354_v17  ;;  %p828_p11 = scmp.ne.s32.totalorder %s1146_s12, %s827_s8  ;;  %s899_s7 = smov [#allocation5]  }
  0x3c   : > { %255 = vadd.xlane.f32.xlu0 %v254_v10  ;;  %s831_s9 = sshll.u32 %s899_s7, 4  ;;  %s832_s9 = int_to_ptr.vmem [resolvable:$false] %s831_s9 }
  0x3d   : > { %261 = vadd.xlane.f32.xlu1 %v260_v11  ;;  %p829_p13 = pnand %p828_p11, %p1210_p12  ;;  %s833_s10 = scalar_lea.vmem %s832_s9, 2048 }
  0x3e   : > { %p834_p5 = scmp.lt.s32.totalorder %s1146_s12, %s832_s9  ;;  %p835_p7 = scmp.lt.s32.totalorder %s833_s10, %s827_s8 }
  0x3f   : > { %p830_p4 = pneg %p829_p13 }
  0x40   : > { %p836_p8 = por %p835_p7, %p834_p5 }
  0x42   : > { %p837_p10 = pnand %p836_p8, %p830_p4 }
  0x4e   : > { %342 = vbcast.lane.b32.xlu1 %v336_v16, 264 }
  0x52   : > { %357 = vbcast.lane.b32.xlu1 %v355_v18, 256  ;;  %338 = vbcast.lane.b32.xlu0 %v336_v16, 256 }
  0x56   : > { %361 = vbcast.lane.b32.xlu1 %v355_v18, 264 }
  0xc1   : > { %v253_v19 = vpop.xlane.xlu0 %252 }
  0xc2   : > { %v263_v20 = vmul.f32 0.00390625, %v253_v19  ;;  %v259_v21 = vpop.xlane.xlu1 %258 }
  0xc3   : > { %v1073_v22 = vmul.f32 0.00390625, %v259_v21 }
  0xc4   : > { %v267_v23 = vsub.f32 %v1039_v0, %v263_v20  ;;  %v268_v24 = vsub.f32 %v1041_v1, %v263_v20 }
  0xc5   : > { %v256_v25 = vpop.xlane.xlu0 %255  ;;  %v271_v26 = vsub.f32 %v1043_v2, %v1073_v22  ;;  %v272_v27 = vsub.f32 %v1047_v4, %v1073_v22 }
  0xc6   : > { %v1081_v28 = vmul.f32 0.00390625, %v256_v25  ;;  %v275_v29 = vmul.f32 %v267_v23, %v267_v23  ;;  %v276_v30 = vmul.f32 %v268_v24, %v268_v24  ;;  %v262_v41 = vpop.xlane.xlu1 %261 }
  0xc7   : > { %v279_v31 = vmul.f32 %v271_v26, %v271_v26  ;;  %v280_v32 = vmul.f32 %v272_v27, %v272_v27  ;;  %v1089_v42 = vmul.f32 0.00390625, %v262_v41 }
  0xc8   : > { %v283_v33 = vadd.f32 %v276_v30, %v275_v29  ;;  %v269_v34 = vsub.f32 %v1049_v5, %v1081_v28  ;;  %v270_v35 = vsub.f32 %v1051_v6, %v1081_v28 }
  0xc9   : > { %v289_v36 = vadd.f32 %v280_v32, %v279_v31  ;;  %v273_v43 = vsub.f32 %v1055_v8, %v1089_v42  ;;  %v274_v44 = vsub.f32 %v1057_v9, %v1089_v42  ;;  %v339_v50 = vpop.permute.xlu0 %338 }
  0xca   : > { %284 = vadd.xlane.f32.xlu0 %v283_v33  ;;  %v277_v37 = vmul.f32 %v269_v34, %v269_v34  ;;  %v278_v38 = vmul.f32 %v270_v35, %v270_v35  ;;  %v343_v48 = vpop.permute.xlu1 %342 }
  0xcb   : > { %v281_v45 = vmul.f32 %v273_v43, %v273_v43  ;;  %v282_v46 = vmul.f32 %v274_v44, %v274_v44 }
  0xcc   : > { %v286_v39 = vadd.f32 %v278_v38, %v277_v37 }
  0xcd   : > { %v292_v47 = vadd.f32 %v282_v46, %v281_v45  ;;  %v720_v45 = vld [vmem:[%s1198_s2] ss:$0 sm:$0xff]  ;;  %v897_v46 = vmov 1  }
  0xce   : > { %290 = vadd.xlane.f32.xlu0 %v289_v36  ;;  %287 = vadd.xlane.f32.xlu1 %v286_v39  ;;  %v358_v49 = vpop.permute.xlu1 %357 }
  0xd2   : > { %v362_v51 = vpop.permute.xlu1 %361 }
  0xdf   : > { %365 = vbcast.lane.b32.xlu1 %v355_v18, 272 }
  0xe4   : > { %346 = vbcast.lane.b32.xlu0 %v336_v16, 272 }
  0xe8   : > { %350 = vbcast.lane.b32.xlu0 %v336_v16, 280 }
 0x103   : > { %293 = vadd.xlane.f32.xlu1 %v292_v47  ;;  %v484_v47 = vld [vmem:[%s1199_s3] sm:$0xff] }
 0x114   : > { %369 = vbcast.lane.b32.xlu1 %v355_v18, 280 }
 0x153   : > { %v285_v52 = vpop.xlane.xlu0 %284 }
 0x154   : > { %v295_v53 = vmul.f32 0.00390625, %v285_v52  ;;  %v420_v52 = vand.u32 127, %v333_v12 }
 0x156   : > { %787 = vrsqrt.f32 %v295_v53  ;;  %vm301_vm0 = vcmp.eq.f32.partialorder %v295_v53, inf  ;;  %v304_v60 = vand.u32 2147483648, %v295_v53  ;;  %vm303_vm1 = vcmp.eq.f32.partialorder %v295_v53, 0.0 }
 0x157   : > { %v288_v54 = vpop.xlane.xlu1 %287  ;;  %v291_v55 = vpop.xlane.xlu0 %290 }
 0x158   : > { %v296_v56 = vmul.f32 0.00390625, %v288_v54  ;;  %v297_v57 = vmul.f32 0.00390625, %v291_v55 }
 0x15a   : > { %789 = vrsqrt.f32 %v296_v56  ;;  %vm315_vm2 = vcmp.eq.f32.partialorder %v297_v57, inf  ;;  %v318_v7 = vand.u32 2147483648, %v297_v57  ;;  %vm317_vm3 = vcmp.eq.f32.partialorder %v297_v57, 0.0 }
 0x15b   : > { %791 = vrsqrt.f32 %v297_v57  ;;  %vm308_vm4 = vcmp.eq.f32.partialorder %v296_v56, inf  ;;  %v311_v16 = vand.u32 2147483648, %v296_v56  ;;  %vm310_vm5 = vcmp.eq.f32.partialorder %v296_v56, 0.0  ;;  %v347_v31 = vpop.permute.xlu0 %346 }
 0x15f   : > { %v351_v39 = vpop.permute.xlu0 %350 }
 0x163   : > { %v788_v58 = vpop.eup %787 }
 0x164   : > { %v300_v59 = vmul.f32 %v788_v58, %v295_v53 }
 0x166   : > { %v302_v61 = vsel %vm301_vm0, %v295_v53, %v300_v59  ;;  %v425_v53 = vadd.s32 4294967288, %v420_v52  ;;  %v439_v59 = vadd.s32 4294967272, %v420_v52 }
 0x167   : > { %v790_v62 = vpop.eup %789  ;;  %v305_v63 = vsel %vm303_vm1, %v304_v60, %v302_v61 }
 0x168   : > { %v792_v3 = vpop.eup %791  ;;  %v327_v10 = vadd.f32 %v305_v63, %v263_v20  ;;  %v307_v11 = vmul.f32 %v790_v62, %v296_v56  ;;  %v366_v20 = vpop.permute.xlu1 %365  ;;  %v428_v58 = vsub.s32 %v425_v53, %v1064_v13 }
 0x169   : > { %v314_v15 = vmul.f32 %v792_v3, %v297_v57 }
 0x16a   : > { %v379_v17 = vmul.f32 %v339_v50, %v327_v10  ;;  %v309_v18 = vsel %vm308_vm4, %v296_v56, %v307_v11  ;;  %v383_v30 = vmul.f32 %v358_v49, %v327_v10  ;;  %v487_v49 = vld [vmem:[%s1199_s3 + $0x18] sm:$0xff]  ;;  %v432_v56 = vadd.s32 4294967280, %v420_v52 }
 0x16b   : > { %v316_v19 = vsel %vm315_vm2, %v297_v57, %v314_v15  ;;  %v312_v21 = vsel %vm310_vm5, %v311_v16, %v309_v18  ;;  %v423_v57 = vsub.s32 %v420_v52, %v1064_v13 }
 0x16c   : > { %v319_v23 = vsel %vm317_vm3, %v318_v7, %v316_v19  ;;  %396 = vperm.xlu0 %782, %v379_v17   ;;  %v328_v24 = vadd.f32 %v312_v21, %v1081_v28  ;;  %v442_v7 = vsub.s32 %v439_v59, %v1064_v13 }
 0x16d   : > { %v329_v25 = vadd.f32 %v319_v23, %v1073_v22 }
 0x16e   : > { %v380_v26 = vmul.f32 %v343_v48, %v328_v24  ;;  %v384_v27 = vmul.f32 %v362_v51, %v328_v24  ;;  %v486_v48 = vld [vmem:[%s1199_s3 + $0x10] sm:$0xff] }
 0x16f   : > { %v385_v29 = vmul.f32 %v366_v20, %v329_v25  ;;  %v381_v32 = vmul.f32 %v347_v31, %v329_v25 }
 0x170   : > { %399 = vperm.xlu1 %783, %v380_v26   ;;  %411 = vperm.xlu0 %782, %v384_v27  }
 0x174   : > { %408 = vperm.xlu1 %783, %v383_v30   ;;  %414 = vperm.xlu0 %782, %v385_v29  }
 0x178   : > { %402 = vperm.xlu1 %783, %v381_v32  }
 0x18c   : > { %v294_v33 = vpop.xlane.xlu1 %293 }
 0x18d   : > { %v298_v34 = vmul.f32 0.00390625, %v294_v33 }
 0x18f   : > { %793 = vrsqrt.f32 %v298_v34  ;;  %vm322_vm6 = vcmp.eq.f32.partialorder %v298_v34, inf  ;;  %v325_v28 = vand.u32 2147483648, %v298_v34  ;;  %vm324_vm7 = vcmp.eq.f32.partialorder %v298_v34, 0.0 }
 0x190   : > { %v370_v38 = vpop.permute.xlu1 %369 }
 0x19c   : > { %v794_v35 = vpop.eup %793 }
 0x19d   : > { %v321_v36 = vmul.f32 %v794_v35, %v298_v34 }
 0x19f   : > { %v323_v22 = vsel %vm322_vm6, %v298_v34, %v321_v36 }
 0x1a0   : > { %v326_v37 = vsel %vm324_vm7, %v325_v28, %v323_v22 }
 0x1a1   : > { %v330_v41 = vadd.f32 %v326_v37, %v1089_v42  ;;  %v485_v42 = vld [vmem:[%s1199_s3 + $0x8] sm:$0xff] }
 0x1a3   : > { %v386_v43 = vmul.f32 %v370_v38, %v330_v41  ;;  %v382_v44 = vmul.f32 %v351_v39, %v330_v41  ;;  %v898_v41 = vmov 1966171168  }
 0x1a5   : > { %417 = vperm.xlu0 %782, %v386_v43   ;;  %405 = vperm.xlu1 %783, %v382_v44   ;;  %v567_v43 = vunpack.c.l.s4 %v898_v41 }
 0x1a9   : > { %479 = vbcast.lane.b32.xlu0 %v720_v45, 256 }
 0x1aa   : > { %784 = vset.pattern.permute.xlu0 %v897_v46 }
 0x1ad   : > { %533 = vperm.xlu0 %784, %v484_v47  }
 0x1b1   : > { %536 = vperm.xlu0 %784, %v485_v42  }
 0x1b5   : > { %539 = vperm.xlu0 %784, %v486_v48  }
 0x1b9   : > { %542 = vperm.xlu0 %784, %v487_v49  }
 0x1bd   : > { %785 = vset.pattern.permute.xlu0 %v896_v40  ;;  %v435_v40 = vsub.s32 %v432_v56, %v1064_v13 }
 0x1be   : > { %499 = vperm.xlu0 %785, %v484_v47  }
 0x1c2   : > { %502 = vperm.xlu0 %785, %v485_v42  }
 0x1c6   : > { %505 = vperm.xlu0 %785, %v486_v48  }
 0x1ca   : > { %508 = vperm.xlu0 %785, %v487_v49   ;;  %v568_v49 = vunpack.c.0.s8 %v567_v43 }
 0x1ce   : > { %786 = vset.pattern.permute.xlu0 %v897_v46 }
 0x1e7   : > { %v397_v50 = vpop.permute.xlu0 %396 }
 0x1e8   : > { %v424_v11 = vrot.slane %v397_v50, %v423_v57 }
 0x1eb   : > { %v400_v51 = vpop.permute.xlu1 %399  ;;  %v412_v54 = vpop.permute.xlu0 %411 }
 0x1ec   : > { %v429_v63 = vrot.slane %v400_v51, %v428_v58  ;;  %v453_v3 = vrot.slane %v412_v54, %v428_v58  ;;  %v571_v54 = vsub.s32 %v568_v49, %v1064_v13 }
 0x1ee   : > { %v431_v18 = vsel %vm430_vm8, %v429_v63, %v424_v11 }
 0x1ef   : > { %v409_v55 = vpop.permute.xlu1 %408  ;;  %v415_v61 = vpop.permute.xlu0 %414 }
 0x1f0   : > { %v449_v60 = vrot.slane %v409_v55, %v423_v57  ;;  %v458_v12 = vrot.slane %v415_v61, %v435_v40  ;;  %v488_v61 = vld [vmem:[%s1200_s4] sm:$0x1] }
 0x1f2   : > { %v454_v15 = vsel %vm430_vm8, %v453_v3, %v449_v60 }
 0x1f3   : > { %v403_v62 = vpop.permute.xlu1 %402  ;;  %v459_v23 = vsel %vm437_vm9, %v458_v12, %v454_v15 }
 0x1f4   : > { %v436_v10 = vrot.slane %v403_v62, %v435_v40 }
 0x1f6   : > { %v438_v24 = vsel %vm437_vm9, %v436_v10, %v431_v18 }
 0x220   : > { %v406_v16 = vpop.permute.xlu1 %405  ;;  %v418_v17 = vpop.permute.xlu0 %417 }
 0x221   : > { %v443_v19 = vrot.slane %v406_v16, %v442_v7  ;;  %v463_v21 = vrot.slane %v418_v17, %v442_v7 }
 0x223   : > { %v445_v25 = vsel %vm444_vm10, %v443_v19, %v438_v24  ;;  %v464_v26 = vsel %vm444_vm10, %v463_v21, %v459_v23 }
 0x224   : > { %v466_v27 = vsel %vm465_vm11, %v464_v26, %v445_v25  ;;  %v480_v29 = vpop.permute.xlu0 %479 }
 0x225   : > { %v469_v20 = vsel %vm468_vm12, %v466_v27, 0.0 }
 0x226   : > { %470 = vadd.xlane.f32.xlu1 %v469_v20 }
 0x228   : > { %v534_v33 = vpop.permute.xlu0 %533 }
 0x229   : > { %v547_v38 = vrot.slane %v534_v33, %v423_v57 }
 0x22c   : > { %v537_v34 = vpop.permute.xlu0 %536 }
 0x22d   : > { %v551_v39 = vrot.slane %v537_v34, %v428_v58 }
 0x22f   : > { %v552_v47 = vsel %vm430_vm8, %v551_v39, %v547_v38 }
 0x230   : > { %v540_v35 = vpop.permute.xlu0 %539 }
 0x231   : > { %v556_v46 = vrot.slane %v540_v35, %v435_v40 }
 0x233   : > { %v557_v52 = vsel %vm437_vm9, %v556_v46, %v552_v47 }
 0x234   : > { %v543_v36 = vpop.permute.xlu0 %542 }
 0x235   : > { %v561_v50 = vrot.slane %v543_v36, %v442_v7 }
 0x239   : > { %v500_v28 = vpop.permute.xlu0 %499 }
 0x23a   : > { %v513_v44 = vrot.slane %v500_v28, %v423_v57  ;;  %v562_v57 = vsel %vm444_vm10, %v561_v50, %v557_v52 }
 0x23d   : > { %v503_v22 = vpop.permute.xlu0 %502 }
 0x23e   : > { %v517_v45 = vrot.slane %v503_v22, %v428_v58 }
 0x240   : > { %v518_v51 = vsel %vm430_vm8, %v517_v45, %v513_v44 }
 0x241   : > { %v506_v37 = vpop.permute.xlu0 %505 }
 0x242   : > { %v522_v42 = vrot.slane %v506_v37, %v435_v40 }
 0x244   : > { %v523_v55 = vsel %vm437_vm9, %v522_v42, %v518_v51 }
 0x245   : > { %v509_v48 = vpop.permute.xlu0 %508 }
 0x246   : > { %v527_v53 = vrot.slane %v509_v48, %v442_v7 }
 0x248   : > { %v528_v59 = vsel %vm444_vm10, %v527_v53, %v523_v55 }
 0x2af   : > { %v471_v30 = vpop.xlane.xlu1 %470 }
 0x2b0   : > { %v482_v31 = vadd.f32 %v480_v29, %v471_v30 }
 0x2b2   : > { %v483_v32 = vmax.f32 %v482_v31, 0.0 }
 0x2b4   : > { %491 = vperm.xlu1 %783, %v483_v32  }
 0x32f   : > { %v492_v56 = vpop.permute.xlu1 %491 }
 0x330   : > { %v564_v58 = vmul.f32 %v562_v57, %v492_v56  ;;  %v530_v60 = vmul.f32 %v528_v59, %v492_v56 }
 0x332   : > { %v572_v40 = vrot.slane %v564_v58, %v571_v54  ;;  %v531_v63 = vadd.f32 %v530_v60, %v488_v61 }
 0x334   : > { %v573_v62 = vcombine.high %v572_v40, %v572_v40 }
 0x336   : > { %v580_v3 = vrot.slane %v573_v62, %v571_v54 }
 0x338   : > { %v582_v7 = vadd.f32 %v580_v3, %v531_v63 }
 0x33a   : > { %v721_v12 = vmul.f32 -1.442695, %v582_v7 }
 0x33c   : > { %795 = vpow2.f32 %v721_v12 }
 0x349   : > { %v796_v10 = vpop.eup %795 }
 0x34a   : > { %v586_v11 = vadd.f32 1.0, %v796_v10 }
 0x34c   : > { %797 = vrcp.f32 %v586_v11 }
 0x359   : > { %v798_v15 = vpop.eup %797 }
 0x35a   : > { %v592_v16 = vrot.slane %v798_v15, %v335_v14 }
 0x35c   : > { %606 = vbcast.lane.b32.xlu1 %v592_v16, 280  ;;  %594 = vbcast.lane.b32.xlu0 %v592_v16, 256 }
 0x360   : > { %598 = vbcast.lane.b32.xlu0 %v592_v16, 264 }
 0x364   : > { %602 = vbcast.lane.b32.xlu0 %v592_v16, 272 }
 0x3ce   : > { %v607_v17 = vpop.permute.xlu1 %606  ;;  %v595_v18 = vpop.permute.xlu0 %594 }
 0x3cf   : > { %v614_v19 = vmul.f32 %v607_v17, %v1055_v8  ;;  %v615_v21 = vmul.f32 %v607_v17, %v1057_v9  ;;  %v608_v23 = vmul.f32 %v595_v18, %v1039_v0  ;;  %v609_v24 = vmul.f32 %v595_v18, %v1041_v1 }
 0x3d1   : > { %622 = vst [vmem:[%s242_s29 + $0x30] sm:$0xff] %v614_v19  ;;  %623 = vst [vmem:[%s242_s29 + $0x38] sm:$0xff] %v615_v21 }
 0x3d2   : > { %616 = vst [vmem:[%s242_s29] sm:$0xff] %v608_v23  ;;  %617 = vst [vmem:[%s242_s29 + $0x8] sm:$0xff] %v609_v24  ;;  %v599_v13 = vpop.permute.xlu0 %598 }
 0x3d3   : > { %v610_v14 = vmul.f32 %v599_v13, %v1049_v5  ;;  %v611_v8 = vmul.f32 %v599_v13, %v1051_v6 }
 0x3d5   : > { %618 = vst [vmem:[%s242_s29 + $0x10] sm:$0xff] %v610_v14  ;;  %619 = vst [vmem:[%s242_s29 + $0x18] sm:$0xff] %v611_v8 }
 0x3d6   : > { %v603_v0 = vpop.permute.xlu0 %602 }
 0x3d7   : > { %v612_v1 = vmul.f32 %v603_v0, %v1043_v2  ;;  %v613_v5 = vmul.f32 %v603_v0, %v1047_v4 }
 0x3d9   : > { %620 = vst [vmem:[%s242_s29 + $0x20] sm:$0xff] %v612_v1  ;;  %621 = vst [vmem:[%s242_s29 + $0x28] sm:$0xff] %v613_v5 }
 0x3da   : > { %840 = shalt.err (!%p837_p10)
}
 0x3db   : > { %s841_s11 = scalar_lea.hbm %s1151_s16, 1024  ;;  %s845_s26 = scalar_lea.hbm %s1201_s5, 2048 }
 0x3dc   : > { %p842_p0 = scmp.ne.s32.totalorder %s1151_s16, %s841_s11  ;;  %p846_p1 = scmp.lt.s32.totalorder %s1151_s16, %s1201_s5 }
 0x3dd   : > { %p847_p3 = scmp.lt.s32.totalorder %s845_s26, %s841_s11 }
 0x3de   : > { %p843_p2 = pnand %p842_p0, %p1210_p12 }
 0x3df   : > { %p848_p6 = por %p847_p3, %p846_p1 }
 0x3e0   : > { %p844_p9 = pneg %p843_p2 }
 0x3e2   : > { %p849_p11 = pnand %p848_p6, %p844_p9 }
 0x3e4   : > { %852 = shalt.err (!%p849_p11)
}
 0x3e5   : > { %s900_s14 = smov 256   ;;  %s901_s25 = smov 16  }
 0x3e6   : > { %731 = dma.vmem_to_hbm [thread:$0]  (%p1210_p12), %s1146_s12, 1024, %s1151_s16, %s625_s22, %s900_s14, %s900_s14, %s901_s25  }
 0x3e7 PF: > { %s653_s15 = sand.u32 1, %s879_s18   ;;  %p1211_p13 = scmp.ne.s32.totalorder %s1207_s6, 0 }
 0x3e8   : > { %p1212_p4 = scmp.ge.s32.totalorder %s891_s21, 2  ;;  %s654_s8 = scalar_lea.sflag [#allocation4], %s653_s15 }
 0x3ea   : > { %p738_p5 = pnand %p1212_p4, %p1211_p13 }
 0x3ec   : > { %p739_p7 = pneg %p738_p5 }
 0x3ee   : > { %874 = dma.done.wait (%p739_p7), %s654_s8, 1024  }
 0x3ef   : > { %876 = vsyncadd (%p739_p7), %s654_s8, 4294966272  ;;  %p18_p8 = scmp.ge.s32.totalorder %s957_s24, 4   ;;  %s1213_s18 = smov %s883_s19 }
 0x3f0   : > { %s1214_s19 = smov %s887_s20  ;;  %s1215_s20 = smov %s969_s27 }
 0x3f1   : > { %s1216_s21 = smov %s957_s24  ;;  %20 = sbr.rel (!%p18_p8) target bundleno = 5 (0x5), region = 85 }
 0x3f6   :  { %659 = vsyncpa [#allocation3], 1 }
 0x3f7   :  { %661 = vsyncpa [#allocation3 + $0x1], 1 }
 0x3f8   :  { %662 = vsyncpa [#allocation4], 1 }
 0x3f9   :  { %664 = vsyncpa [#allocation4 + $0x1], 1 }

</bundles_post_ra>
